<compile_context>
chip_gen: v7x
topology: tpu7x:2x2x1
jax: 0.10.0
libtpu: 0.0.40
codegen_flags: <defaults>
</compile_context>

<pallas_src>
import functools

import jax
import jax.numpy as jnp
from jax import lax
from jax.experimental import pallas as pl
from jax.experimental.pallas import tpu as pltpu

_LANE = 128


def _round_up(x, m):
    return (x + m - 1) // m * m


@functools.lru_cache(maxsize=None)
def _roll_is_jnp_convention():
    """Probe pltpu.roll's rotation direction once on the real backend.

    Returns True when pltpu.roll(x, s, 0)[i] == x[(i - s) % n] (jnp.roll
    convention).  The conv kernel needs "fetch x[i + kw]"; getting the sign wrong
    would silently swap the 3x3 taps, so one tiny (8, 128) kernel pins it down.
    Must be called outside jit (it inspects concrete values).
    """
    def probe(x_ref, o_ref):
        o_ref[...] = pltpu.roll(x_ref[...], 1, 0)

    x = lax.broadcasted_iota(jnp.float32, (8, _LANE), 0)
    y = pl.pallas_call(probe,
                       out_shape=jax.ShapeDtypeStruct((8, _LANE), jnp.float32))(x)
    return bool(jax.device_get(y)[1, 0] == 0.0)


def _fwd_shift(rows, kw, jnp_roll):
    """Static roll amount s.t. pltpu.roll(y, s, 0)[i] == y[(i + kw) % rows]."""
    if kw == 0:
        return 0
    return (rows - kw) if jnp_roll else kw


def _pick_tile_h(h, wp, cin_p, cout_p):
    """Largest even divisor of H whose flattened row count stays inside a
    per-step VMEM budget; the budget shrinks as the padded channel width grows
    (review item 7)."""
    if h % 2:
        raise ValueError("halo row tiling requires an even H")
    max_rows = max(2 * wp, (2048 * _LANE) // max(cin_p, cout_p))
    best = 2
    for t in range(2, h + 1, 2):
        if h % t == 0 and t * wp <= max_rows:
            best = t
    return best


# --------------------------------------------------------------------------------------
# Pass 1: 3x3 conv from (row tile + 2-row halo).  No im2col, no misaligned relayouts:
# the padded width wp is a multiple of the sublane packing, so the flattens below are
# pure reinterpretations and every row slice lands on an aligned boundary; the kw taps
# are combined by rolling the f32 MXU outputs on the XLU.
# --------------------------------------------------------------------------------------
def _conv_accumulate(xm_ref, xh_ref, w_ref, acc_ref, *, tile_h, wp, jnp_roll):
    """xm_ref: (1, tile_h, wp, cin_p) main rows of the zero-padded input
    xh_ref : (1, 2, wp, cin_p)      2-row bottom halo
    w_ref  : (9, cin_p, cout_p)     tap-major weights (index kh*3 + kw)
    acc_ref: (tile_h * wp, cout_p)  f32 scratch accumulator

    Rolled-in wrap rows only ever land in the padded columns >= W, which are
    dropped before anything is stored or summed into the BN statistics.
    """
    cin_p = xm_ref.shape[-1]
    m_rows = tile_h * wp
    main = xm_ref[...].reshape(m_rows, cin_p)      # free: wp is sublane/pack aligned
    halo = xh_ref[...].reshape(2 * wp, cin_p)

    def tap(x_rows, kh, kw):
        d = jnp.dot(x_rows, w_ref[kh * 3 + kw], preferred_element_type=jnp.float32)
        s = _fwd_shift(d.shape[0], kw, jnp_roll)
        return d if s == 0 else pltpu.roll(d, s, 0)

    # kh == 0 covers every output row of the tile: it initialises the accumulator.
    acc_ref[...] = tap(main, 0, 0) + tap(main, 0, 1) + tap(main, 0, 2)

    for kh in (1, 2):
        lo = (tile_h - kh) * wp                     # sublane-aligned split point
        if lo > 0:
            dm = None
            for kw in range(3):
                y = tap(main[kh * wp:, :], kh, kw)
                dm = y if dm is None else dm + y
            acc_ref[0:lo, :] += dm
        dh = None
        for kw in range(3):
            y = tap(halo[0:kh * wp, :], kh, kw)
            dh = y if dh is None else dh + y
        acc_ref[lo:m_rows, :] += dh


def _conv3x3_stats_kernel(xm_ref, xh_ref, w_ref, y_ref, sum_ref, sq_ref, acc_ref,
                          *, tile_h, wp, out_w, jnp_roll):
    # Conv bias is intentionally omitted: BatchNorm's mean subtraction cancels it.
    _conv_accumulate(xm_ref, xh_ref, w_ref, acc_ref,
                     tile_h=tile_h, wp=wp, jnp_roll=jnp_roll)
    cout_p = acc_ref.shape[-1]
    acc = acc_ref[...].reshape(tile_h, wp, cout_p)[:, :out_w, :]   # drop padded cols
    y_ref[...] = acc[None].astype(y_ref.dtype)

    # Per-batch statistic accumulators: resident blocks along the row-tile axis only,
    # so the batch axis can stay "parallel" (review item 2 / correctness concern 2).
    @pl.when(pl.program_id(1) == 0)
    def _init():
        sum_ref[...] = jnp.zeros_like(sum_ref)
        sq_ref[...] = jnp.zeros_like(sq_ref)

    sum_ref[...] += jnp.sum(acc, axis=(0, 1), keepdims=True)
    sq_ref[...] += jnp.sum(acc * acc, axis=(0, 1), keepdims=True)


def _conv3x3_bias_relu_kernel(xm_ref, xh_ref, w_ref, b_ref, o_ref, acc_ref,
                              *, tile_h, wp, out_w, jnp_roll):
    _conv_accumulate(xm_ref, xh_ref, w_ref, acc_ref,
                     tile_h=tile_h, wp=wp, jnp_roll=jnp_roll)
    cout_p = acc_ref.shape[-1]
    acc = acc_ref[...].reshape(tile_h, wp, cout_p)[:, :out_w, :]
    y = jnp.maximum(acc + b_ref[...].reshape(1, 1, cout_p), 0.0)
    o_ref[...] = y[None].astype(o_ref.dtype)


# --------------------------------------------------------------------------------------
# Pass 2: folded BN scale/shift + ReLU over large lane-dense row tiles.
# --------------------------------------------------------------------------------------
def _scale_shift_relu_kernel(y_ref, scale_ref, shift_ref, o_ref):
    y = y_ref[...].astype(jnp.float32)
    o_ref[...] = jnp.maximum(y * scale_ref[...] + shift_ref[...], 0.0)


# --------------------------------------------------------------------------------------
# NHWC forward (core) and NCHW PyTorch-parity wrapper.
# --------------------------------------------------------------------------------------
def conv3x3_bn_relu_nhwc(x_nhwc, weight, bias, gamma, beta, *, use_bn=True, eps=1e-5,
                         compute_dtype=jnp.bfloat16):
    """x_nhwc: (N, H, W, Cin) f32; weight: PyTorch OIHW (Cout, Cin, 3, 3). NHWC f32 out."""
    n, h, w, cin = x_nhwc.shape
    cout = weight.shape[0]
    assert weight.shape == (cout, cin, 3, 3)

    compute_dtype = jnp.dtype(compute_dtype)
    jnp_roll = _roll_is_jnp_convention()

    cin_p = _round_up(cin, _LANE)
    cout_p = _round_up(cout, _LANE)
    # Padded width: >= W+2 and a multiple of the sublane packing (8 rows for 32-bit,
    # 16 for 16-bit operands) so in-kernel flattens / row slices stay aligned.
    sub = 8 if compute_dtype.itemsize == 4 else 16
    wp = _round_up(w + 2, sub)
    tile_h = _pick_tile_h(h, wp, cin_p, cout_p)
    grid = (n, h // tile_h)

    # TODO(synk): tiny channel counts (e.g. C=4) are still padded to 128 lanes; a
    # packed-width VPU path would avoid the lane-padding HBM inflation (item 10).
    # TODO(synk): the 1-pixel ring + channel/width padding is one wrapper-side pad;
    # handling the ring in-kernel would save ~one extra read+write of the input (item 6).
    x_pad = jnp.pad(x_nhwc.astype(compute_dtype),
                    ((0, 0), (1, 1), (1, wp - w - 1), (0, cin_p - cin)))
    # (Cout, Cin, kh, kw) -> (kh, kw, Cin, Cout) -> (9, Cin_p, Cout_p)
    w9 = jnp.transpose(weight.astype(compute_dtype), (2, 3, 1, 0)).reshape(9, cin, cout)
    w9 = jnp.pad(w9, ((0, 0), (0, cin_p - cin), (0, cout_p - cout)))

    main_spec = pl.BlockSpec((1, tile_h, wp, cin_p), lambda b, t: (b, t, 0, 0))
    # 2-row halo below the main tile (tile_h is even so the block index is exact).
    halo_spec = pl.BlockSpec((1, 2, wp, cin_p),
                             lambda b, t: (b, ((t + 1) * tile_h) // 2, 0, 0))
    # TODO(synk): the weight block never changes; pipeline_mode=pl.Buffered(1) would
    # avoid double-buffering it (small VMEM saving, skipped for portability, item 9).
    w_spec = pl.BlockSpec((9, cin_p, cout_p), lambda b, t: (0, 0, 0))
    y_spec = pl.BlockSpec((1, tile_h, w, cout_p), lambda b, t: (b, t, 0, 0))
    stat_spec = pl.BlockSpec((1, 1, cout_p), lambda b, t: (b, 0, 0))

    in_bytes = compute_dtype.itemsize
    y_dtype = jnp.bfloat16 if compute_dtype.itemsize == 2 else jnp.float32
    y_bytes = jnp.dtype(y_dtype).itemsize if use_bn else 4
    blk = ((tile_h * wp * cin_p + 2 * wp * cin_p + 9 * cin_p * cout_p) * in_bytes
           + tile_h * w * cout_p * y_bytes + 3 * cout_p * 4)
    est = 2 * blk + tile_h * wp * cout_p * 4          # double-buffered blocks + f32 acc
    vmem_limit = int(min(64 * 2**20, max(32 * 2**20, 2 * est)))

    if not use_bn:
        b_p = jnp.pad(bias.astype(jnp.float32).reshape(1, cout),
                      ((0, 0), (0, cout_p - cout)))
        kernel = functools.partial(_conv3x3_bias_relu_kernel, tile_h=tile_h, wp=wp,
                                   out_w=w, jnp_roll=jnp_roll)
        out_p = pl.pallas_call(
            kernel,
            grid=grid,
            in_specs=[main_spec, halo_spec, w_spec,
                      pl.BlockSpec((1, cout_p), lambda b, t: (0, 0))],
            out_specs=y_spec,
            out_shape=jax.ShapeDtypeStruct((n, h, w, cout_p), jnp.float32),
            scratch_shapes=[pltpu.VMEM((tile_h * wp, cout_p), jnp.float32)],
            compiler_params=pltpu.CompilerParams(
                dimension_semantics=("parallel", "parallel"),
                vmem_limit_bytes=vmem_limit),
        )(x_pad, x_pad, w9, b_p)
        return out_p if cout_p == cout else out_p[..., :cout]

    # ---- pass 1: conv + per-batch, per-channel sum / sum-of-squares ----
    kernel1 = functools.partial(_conv3x3_stats_kernel, tile_h=tile_h, wp=wp,
                                out_w=w, jnp_roll=jnp_roll)
    y_p, csum, csq = pl.pallas_call(
        kernel1,
        grid=grid,
        in_specs=[main_spec, halo_spec, w_spec],
        out_specs=(y_spec, stat_spec, stat_spec),
        out_shape=(jax.ShapeDtypeStruct((n, h, w, cout_p), y_dtype),
                   jax.ShapeDtypeStruct((n, 1, cout_p), jnp.float32),
                   jax.ShapeDtypeStruct((n, 1, cout_p), jnp.float32)),
        scratch_shapes=[pltpu.VMEM((tile_h * wp, cout_p), jnp.float32)],
        compiler_params=pltpu.CompilerParams(
            # batch axis parallel (per-batch stat blocks -> megacore-shardable on v7x);
            # row-tile axis is the sequential statistics-accumulation axis.
            dimension_semantics=("parallel", "arbitrary"),
            vmem_limit_bytes=vmem_limit),
    )(x_pad, x_pad, w9)

    # ---- tiny glue: finalize batch statistics, fold gamma/beta into scale/shift ----
    # Per-batch partial sums are combined here in f32 (mild mitigation of the
    # E[x^2] - E[x]^2 cancellation noted in the review).
    m_total = jnp.float32(n * h * w)
    mean = jnp.sum(csum, axis=0) / m_total                              # (1, cout_p)
    var = jnp.maximum(jnp.sum(csq, axis=0) / m_total - mean * mean, 0.0)  # biased (train)
    gamma_p = jnp.pad(gamma.astype(jnp.float32).reshape(1, cout),
                      ((0, 0), (0, cout_p - cout)))
    beta_p = jnp.pad(beta.astype(jnp.float32).reshape(1, cout),
                     ((0, 0), (0, cout_p - cout)))
    scale = gamma_p * lax.rsqrt(var + eps)
    shift = beta_p - mean * scale

    # ---- pass 2: y * scale + shift, ReLU, over lane-dense (tile_m, Cout_p) tiles ----
    m_rows = n * h * w
    tile_m = min(4096, _round_up(m_rows, 8))
    y2d = y_p.reshape(m_rows, cout_p)                 # contiguous reshape (free)
    # TODO(synk): with a bf16 final output this buffer could be updated in place via
    # input_output_aliases={0: 0}; kept f32 here for PyTorch output-dtype parity.
    out2d = pl.pallas_call(
        _scale_shift_relu_kernel,
        grid=(pl.cdiv(m_rows, tile_m),),
        in_specs=[pl.BlockSpec((tile_m, cout_p), lambda i: (i, 0)),
                  pl.BlockSpec((1, cout_p), lambda i: (0, 0)),
                  pl.BlockSpec((1, cout_p), lambda i: (0, 0))],
        out_specs=pl.BlockSpec((tile_m, cout_p), lambda i: (i, 0)),
        out_shape=jax.ShapeDtypeStruct((m_rows, cout_p), jnp.float32),
        compiler_params=pltpu.CompilerParams(
            dimension_semantics=("parallel",),
            vmem_limit_bytes=32 * 2**20),
    )(y2d, scale, shift)

    out = out2d.reshape(n, h, w, cout_p)
    return out if cout_p == cout else out[..., :cout]   # no-op when C % 128 == 0


def dummy_c2f_forward(x_nchw, weight, bias, gamma=None, beta=None, *, use_bn=True,
                      eps=1e-5, compute_dtype=jnp.bfloat16):
    """PyTorch-parity wrapper (DummyC2f.forward). NCHW<->NHWC transposes are
    check-only glue; the Pallas core is NHWC end-to-end."""
    x_nhwc = jnp.transpose(x_nchw, (0, 2, 3, 1))
    y = conv3x3_bn_relu_nhwc(x_nhwc, weight, bias, gamma, beta,
                             use_bn=use_bn, eps=eps, compute_dtype=compute_dtype)
    return jnp.transpose(y, (0, 3, 1, 2))


def _reference_forward(x_nchw, weight, bias, gamma, beta, *, use_bn=True, eps=1e-5):
    """Pure-JAX reference mirroring PyTorch semantics (training-mode BN, biased var)."""
    y = lax.conv_general_dilated(
        x_nchw.astype(jnp.float32),
        weight.astype(jnp.float32),
        window_strides=(1, 1),
        padding=((1, 1), (1, 1)),
        dimension_numbers=("NCHW", "OIHW", "NCHW"),
        precision=lax.Precision.HIGHEST,
    ) + bias.reshape(1, -1, 1, 1)
    if use_bn:
        mean = jnp.mean(y, axis=(0, 2, 3), keepdims=True)
        var = jnp.mean(jnp.square(y - mean), axis=(0, 2, 3), keepdims=True)
        y = (y - mean) * lax.rsqrt(var + eps)
        y = y * gamma.reshape(1, -1, 1, 1) + beta.reshape(1, -1, 1, 1)
    return jnp.maximum(y, 0.0)


if __name__ == "__main__":
    def _make_inputs(key, n, c, hw):
        kx, kw, kb, kg, kbe = jax.random.split(key, 5)
        x = jax.random.normal(kx, (n, c, hw, hw), dtype=jnp.float32)
        weight = jax.random.normal(kw, (c, c, 3, 3), dtype=jnp.float32) * 0.1
        bias = jax.random.normal(kb, (c,), dtype=jnp.float32) * 0.1
        gamma = 1.0 + 0.1 * jax.random.normal(kg, (c,), dtype=jnp.float32)
        beta = 0.1 * jax.random.normal(kbe, (c,), dtype=jnp.float32)
        return x, weight, bias, gamma, beta

    def _check(out, ref, tol):
        assert out.shape == ref.shape
        err = float(jnp.max(jnp.abs(out - ref) / (1.0 + jnp.abs(ref))))
        assert err < tol, f"max relative error {err} >= {tol}"

    key = jax.random.PRNGKey(0)
    k1, k2 = jax.random.split(key)

    # Case 1: C2f-like channel width (the Model's C2f blocks use >=128 channels).
    # Tolerances reflect bf16 MXU operands (K = 9*128 accumulation) + bf16 intermediate.
    x, w_, b_, g_, be_ = _make_inputs(k1, 2, 128, 16)
    ref = jax.block_until_ready(_reference_forward(x, w_, b_, g_, be_, use_bn=True))
    out_bf = jax.block_until_ready(dummy_c2f_forward(x, w_, b_, g_, be_, use_bn=True))
    _check(out_bf, ref, 5e-2)
    out_f32 = jax.block_until_ready(
        dummy_c2f_forward(x, w_, b_, g_, be_, use_bn=True, compute_dtype=jnp.float32))
    _check(out_f32, ref, 2e-2)

    # Case 2: tiny channel count (exercises the lane-padding path), with/without BN.
    x2, w2, b2, g2, be2 = _make_inputs(k2, 2, 4, 16)
    ref2 = jax.block_until_ready(_reference_forward(x2, w2, b2, g2, be2, use_bn=True))
    out2 = jax.block_until_ready(dummy_c2f_forward(x2, w2, b2, g2, be2, use_bn=True))
    _check(out2, ref2, 5e-2)
    ref3 = jax.block_until_ready(_reference_forward(x2, w2, b2, g2, be2, use_bn=False))
    out3 = jax.block_until_ready(dummy_c2f_forward(x2, w2, b2, g2, be2, use_bn=False))
    _check(out3, ref3, 5e-2)

    print("KERNEL_OK")
</pallas_src>

<mosaic_0001>
module attributes {stable_mosaic.version = 11 : i64} {
  func.func @probe(%arg0: memref<8x128xf32, #tpu.memory_space<vmem>>, %arg1: memref<8x128xf32, #tpu.memory_space<vmem>>) attributes {dimension_semantics = [], scalar_prefetch = 0 : i64, scratch_operands = 0 : i64, tpu.core_type = #tpu.core_type<tc>} {
    %c0 = arith.constant 0 : index
    %c0_0 = arith.constant 0 : index
    %0 = vector.load %arg0[%c0, %c0_0] : memref<8x128xf32, #tpu.memory_space<vmem>>, vector<8x128xf32>
    %c1_i32 = arith.constant 1 : i32
    %1 = tpu.dynamic_rotate %0 by %c1_i32 dim 0 : vector<8x128xf32>, i32 -> vector<8x128xf32>
    %c0_1 = arith.constant 0 : index
    %c0_2 = arith.constant 0 : index
    %2 = vector.load %arg1[%c0_1, %c0_2] : memref<8x128xf32, #tpu.memory_space<vmem>>, vector<8x128xf32>
    tpu.vector_store %arg1[%c0_1, %c0_2], %1 {strides = array<i32>} : memref<8x128xf32, #tpu.memory_space<vmem>>, vector<8x128xf32>,
    return
  }
}

</mosaic_0001>

<bundles_post_ra>
// kernel: tpu_custom_call.1
= control target key start
LH: loop header
LB: loop body
LE: loop exit
PB: predicated region body
PF: predicated region fallthrough
CT: control target
= control target key end

     0   :  { %6 = vsyncpa [#allocation3], 0  ;;  %s125_s0 = inlined_call_operand.hbm [shape: f32[8,128], index: 0, kind: input, shape index: {}]   ;;  %s126_s1 = inlined_call_operand.hbm [shape: f32[8,128], index: 1, kind: output, shape index: {}]  }
   0x1   :  { %7 = vsyncpa [#allocation4], 0  ;;  %s89_s6 = smov [#allocation2]   ;;  %s41_s10 = scalar_lea.hbm %s125_s0, 128 }
   0x2   :  { %s14_s7 = sshll.u32 %s89_s6, 4  ;;  %p42_p0 = scmp.ne.s32.totalorder %s125_s0, %s41_s10  ;;  %s15_s7 = int_to_ptr.vmem [resolvable:$true] %s14_s7 }
   0x3   :  { %p45_p1 = scmp.lt.u32.totalorder %s41_s10, %s125_s0 }
   0x5   :  { %p47_p2 = pnand %p45_p1, %p42_p0 }
   0x7   :  { %50 = shalt.err (!%p47_p2)
}
   0x8   :  { %s51_s15 = scalar_lea.vmem %s15_s7, 128  ;;  %p56_p4 = scmp.lt.s32.totalorder %s15_s7, %s15_s7 }
   0x9   :  { %p52_p3 = scmp.ne.s32.totalorder %s15_s7, %s51_s15  ;;  %p57_p5 = scmp.lt.s32.totalorder %s51_s15, %s51_s15 }
   0xb   :  { %p58_p6 = por %p57_p5, %p56_p4 }
   0xd   :  { %p59_p7 = pnand %p58_p6, %p52_p3 }
   0xf   :  { %62 = shalt.err (!%p59_p7)
}
  0x10   :  { %17 = dma.hbm_to_vmem [thread:$0]  %s125_s0, 128, %s15_s7, [#allocation3]  }
  0x11   :  { %85 = dma.done.wait [#allocation3], 128  }
  0x12   :  { %86 = vsyncadd [#allocation3], 4294967168  ;;  %s90_s18 = smov [#allocation5]   ;;  %v21_v0 = vld [vmem:[#allocation2] sm:$0xff] }
  0x13   :  { %s30_s19 = sshll.u32 %s90_s18, 4  ;;  %v22_v1 = vrot.slane %v21_v0, 7  ;;  %s31_s19 = int_to_ptr.vmem [resolvable:$true] %s30_s19 }
  0x14   :  { %s63_s20 = scalar_lea.vmem %s31_s19, 128  ;;  %p68_p9 = scmp.lt.s32.totalorder %s31_s19, %s31_s19 }
  0x15   :  { %23 = vst [vmem:[#allocation5] sm:$0xff] %v22_v1  ;;  %p64_p8 = scmp.ne.s32.totalorder %s31_s19, %s63_s20  ;;  %p69_p10 = scmp.lt.s32.totalorder %s63_s20, %s63_s20 }
  0x17   :  { %p70_p11 = por %p69_p10, %p68_p9 }
  0x19   :  { %p71_p12 = pnand %p70_p11, %p64_p8 }
  0x1b   :  { %74 = shalt.err (!%p71_p12)
}
  0x1c   :  { %s75_s23 = scalar_lea.hbm %s126_s1, 128 }
  0x1d   :  { %p76_p13 = scmp.ne.s32.totalorder %s126_s1, %s75_s23  ;;  %p79_p0 = scmp.lt.u32.totalorder %s75_s23, %s126_s1 }
  0x1f   :  { %p81_p1 = pnand %p79_p0, %p76_p13 }
  0x21   :  { %84 = shalt.err (!%p81_p1)
}
  0x22   :  { %33 = dma.vmem_to_hbm [thread:$0]  %s31_s19, 128, %s126_s1, [#allocation4]  }
  0x23   :  { %87 = dma.done.wait [#allocation4], 128  }
  0x24   :  { %88 = vsyncadd [#allocation4], 4294967168 }
  0x25   :  { %37 = vsyncpa [#allocation3], 1 }
  0x26   :  { %38 = vsyncpa [#allocation4], 1 }

</bundles_post_ra>
